<compile_context>
chip_gen: v6e
topology: v6e:2x2x1
jax: 0.10.0
libtpu: 0.0.40
codegen_flags: <defaults>
</compile_context>

<pallas_src>
import jax
import jax.numpy as jnp
import numpy as np
from jax.experimental import pallas as pl
from jax.experimental.pallas import tpu as pltpu

EPS = 1e-5


def _bn_relu(acc, gavg, gamma_l, beta_l):
    """BatchNorm (batch stats, biased var) + ReLU on a lane-dense (rows, W*C) slab.

    acc     : (rows, L) f32 conv output, lane index l = w_pos * C + c
    gavg    : (L, L)    f32, gavg[l, l'] = 1/(N*H*W) if (l % C) == (l' % C) else 0
    gamma_l : (1, L)    gamma broadcast over the W lane-groups
    beta_l  : (1, L)    beta  broadcast over the W lane-groups
    """
    rowsum = jnp.sum(acc, axis=0, keepdims=True)                        # (1, L)
    mean_l = jnp.dot(rowsum, gavg, preferred_element_type=jnp.float32)  # per-channel mean
    centered = acc - mean_l
    sqsum = jnp.sum(centered * centered, axis=0, keepdims=True)
    var_l = jnp.dot(sqsum, gavg, preferred_element_type=jnp.float32)    # biased variance
    scale = gamma_l * jax.lax.rsqrt(var_l + EPS)                        # EUP rsqrt
    return jnp.maximum(centered * scale + beta_l, 0.0)


def downblock_kernel(x_ref, w1_ref, w2_ref, bn_ref, gavg_ref, o_ref,
                     xpad1_ref, xpad2_ref):
    """Fused DownBlock: (conv3x3 + BN + ReLU) x 2, all resident in VMEM.

    x_ref    : (N, H, W*Cin)        input rows, lane-dense
    w1_ref   : (KH, W*Cin,  W*Cout) banded conv1 weights (width taps + SAME pad folded)
    w2_ref   : (KH, W*Cout, W*Cout) banded conv2 weights
    bn_ref   : (4, W*Cout)          rows: gamma1, beta1, gamma2, beta2 (lane-broadcast)
    gavg_ref : (W*Cout, W*Cout)     channel-group averaging matrix (includes 1/(N*H*W))
    o_ref    : (N*H, W*Cout)        lane-dense output
    xpad1/2  : (N, H+2*pad, L)      VMEM scratch for the vertical (row) halo
    """
    N, H, L_in = x_ref.shape
    KH, _, L_out = w1_ref.shape
    pad = KH // 2
    rows = N * H

    # ---- conv1: zero-pad rows in VMEM, then KH accumulated lane-dense matmuls ----
    xpad1_ref[...] = jnp.zeros_like(xpad1_ref)
    xpad1_ref[:, pad:pad + H, :] = x_ref[...]

    acc = jnp.zeros((rows, L_out), jnp.float32)
    for dy in range(KH):  # static unroll (KH == 3)
        patch = xpad1_ref[:, dy:dy + H, :].reshape(rows, L_in)
        acc = acc + jnp.dot(patch, w1_ref[dy], preferred_element_type=jnp.float32)

    y1 = _bn_relu(acc, gavg_ref[...], bn_ref[0:1, :], bn_ref[1:2, :])

    # ---- conv2: intermediate stays in VMEM; re-pad rows, KH matmuls again ----
    xpad2_ref[...] = jnp.zeros_like(xpad2_ref)
    xpad2_ref[:, pad:pad + H, :] = y1.reshape(N, H, L_out)

    acc2 = jnp.zeros((rows, L_out), jnp.float32)
    for dy in range(KH):
        patch2 = xpad2_ref[:, dy:dy + H, :].reshape(rows, L_out)
        acc2 = acc2 + jnp.dot(patch2, w2_ref[dy], preferred_element_type=jnp.float32)

    o_ref[...] = _bn_relu(acc2, gavg_ref[...], bn_ref[2:3, :], bn_ref[3:4, :])


def _band_weights(w_hwio, width):
    """Fold horizontal taps + SAME width padding into lane-dense banded matrices.

    w_hwio: (KH, KW, Cin, Cout) -> (KH, width*Cin, width*Cout) with
    out[dy, xw*Cin+ci, xo*Cout+co] = w[dy, xw-xo+pad, ci, co]  (0 where the tap is OOB).
    """
    KH, KW, Cin, Cout = w_hwio.shape
    pad = KW // 2
    shift = jnp.stack([jnp.eye(width, k=pad - dx, dtype=w_hwio.dtype)
                       for dx in range(KW)])                     # (KW, xw, xo)
    wd = jnp.einsum('dab,edij->eaibj', shift, w_hwio)            # (KH, xw, Cin, xo, Cout)
    return wd.reshape(KH, width * Cin, width * Cout)


def down_block(x_nchw, params):
    """DownBlock forward, NCHW in / NCHW out (matches the PyTorch module)."""
    N, Cin, H, W = x_nchw.shape
    KH, KW, _, Cout = params["w1"].shape
    pad = KH // 2
    L_in, L_out = W * Cin, W * Cout
    rows = N * H

    # Layout plumbing (outside the kernel): NCHW -> lane-dense (N, H, W*Cin).
    x2d = jnp.transpose(x_nchw, (0, 2, 3, 1)).reshape(N, H, L_in)

    wd1 = _band_weights(params["w1"], W)                         # (KH, L_in,  L_out)
    wd2 = _band_weights(params["w2"], W)                         # (KH, L_out, L_out)

    # gamma/beta broadcast across the W lane-groups; stacked into one (4, L_out) block.
    bn = jnp.stack([
        jnp.tile(params["gamma1"].reshape(Cout), W),
        jnp.tile(params["beta1"].reshape(Cout), W),
        jnp.tile(params["gamma2"].reshape(Cout), W),
        jnp.tile(params["beta2"].reshape(Cout), W),
    ]).astype(jnp.float32)

    # Channel-group averaging matrix: sums the W lane-groups of a per-lane row sum and
    # broadcasts the per-channel result back to every lane; scaled by 1/(N*H*W).
    gavg = jnp.tile(jnp.eye(Cout, dtype=jnp.float32), (W, W)) / float(N * H * W)

    out2d = pl.pallas_call(
        downblock_kernel,
        out_shape=jax.ShapeDtypeStruct((rows, L_out), jnp.float32),
        grid=(1,),
        in_specs=[
            pl.BlockSpec((N, H, L_in), lambda i: (0, 0, 0)),
            pl.BlockSpec((KH, L_in, L_out), lambda i: (0, 0, 0)),
            pl.BlockSpec((KH, L_out, L_out), lambda i: (0, 0, 0)),
            pl.BlockSpec((4, L_out), lambda i: (0, 0)),
            pl.BlockSpec((L_out, L_out), lambda i: (0, 0)),
        ],
        out_specs=pl.BlockSpec((rows, L_out), lambda i: (0, 0)),
        scratch_shapes=[
            pltpu.VMEM((N, H + 2 * pad, L_in), jnp.float32),
            pltpu.VMEM((N, H + 2 * pad, L_out), jnp.float32),
        ],
        compiler_params=pltpu.CompilerParams(
            dimension_semantics=("arbitrary",),
        ),
    )(x2d, wd1, wd2, bn, gavg)

    # Lane-dense slab -> NHWC -> NCHW.
    return jnp.transpose(out2d.reshape(N, H, W, Cout), (0, 3, 1, 2))


# ---------------- pure-JAX reference (correctness sanity check) ----------------
def conv_block_ref(x_nhwc, w_hwio, gamma, beta):
    out = jax.lax.conv_general_dilated(
        x_nhwc, w_hwio, window_strides=(1, 1), padding="SAME",
        dimension_numbers=("NHWC", "HWIO", "NHWC"),
    )
    mean = out.mean(axis=(0, 1, 2), keepdims=True)
    var = ((out - mean) ** 2).mean(axis=(0, 1, 2), keepdims=True)
    y = (out - mean) * jax.lax.rsqrt(var + EPS)
    y = y * gamma.reshape(1, 1, 1, -1) + beta.reshape(1, 1, 1, -1)
    return jnp.maximum(y, 0.0)


def down_block_ref(x_nchw, params):
    x = jnp.transpose(x_nchw, (0, 2, 3, 1))
    x = conv_block_ref(x, params["w1"], params["gamma1"], params["beta1"])
    x = conv_block_ref(x, params["w2"], params["gamma2"], params["beta2"])
    return jnp.transpose(x, (0, 3, 1, 2))


if __name__ == "__main__":
    # DownBlock(in_channels=4, out_channels=8, kernel_size=3)
    N, Cin, Cout, H, W, K = 2, 4, 8, 16, 16, 3

    key = jax.random.PRNGKey(0)
    kx, kw1, kw2 = jax.random.split(key, 3)

    x = jax.random.normal(kx, (N, Cin, H, W), dtype=jnp.float32)  # NCHW like PyTorch

    # Deterministic parameter init (HWIO conv weights; BN gamma=1, beta=0).
    params = {
        "w1": jax.random.normal(kw1, (K, K, Cin, Cout), dtype=jnp.float32) * 0.1,
        "gamma1": jnp.ones((Cout,), jnp.float32),
        "beta1": jnp.zeros((Cout,), jnp.float32),
        "w2": jax.random.normal(kw2, (K, K, Cout, Cout), dtype=jnp.float32) * 0.1,
        "gamma2": jnp.ones((Cout,), jnp.float32),
        "beta2": jnp.zeros((Cout,), jnp.float32),
    }

    out = jax.block_until_ready(jax.jit(down_block)(x, params))
    ref = jax.block_until_ready(down_block_ref(x, params))

    assert out.shape == (N, Cout, H, W), out.shape
    np.testing.assert_allclose(np.asarray(out), np.asarray(ref), rtol=1e-4, atol=1e-4)

    print("KERNEL_OK")
</pallas_src>

<mosaic_0001>
module attributes {stable_mosaic.version = 11 : i64} {
  func.func @downblock_kernel(%arg0: i32, %arg1: memref<2x16x64xf32, #tpu.memory_space<vmem>>, %arg2: memref<3x64x128xf32, #tpu.memory_space<vmem>>, %arg3: memref<3x128x128xf32, #tpu.memory_space<vmem>>, %arg4: memref<4x128xf32, #tpu.memory_space<vmem>>, %arg5: memref<128x128xf32, #tpu.memory_space<vmem>>, %arg6: memref<32x128xf32, #tpu.memory_space<vmem>>, %arg7: memref<2x18x64xf32, #tpu.memory_space<vmem>>, %arg8: memref<2x18x128xf32, #tpu.memory_space<vmem>>) attributes {dimension_semantics = [#tpu.dimension_semantics<arbitrary>], iteration_bounds = array<i64: 1>, scalar_prefetch = 0 : i64, scratch_operands = 2 : i64, tpu.core_type = #tpu.core_type<tc>, window_params = [{pipeline_mode = #tpu.pipeline_mode<synchronous>, transform_indices = @transform_0, window_bounds = array<i64: 2, 16, 64>}, {pipeline_mode = #tpu.pipeline_mode<synchronous>, transform_indices = @transform_1, window_bounds = array<i64: 3, 64, 128>}, {pipeline_mode = #tpu.pipeline_mode<synchronous>, transform_indices = @transform_2, window_bounds = array<i64: 3, 128, 128>}, {pipeline_mode = #tpu.pipeline_mode<synchronous>, transform_indices = @transform_3, window_bounds = array<i64: 4, 128>}, {pipeline_mode = #tpu.pipeline_mode<synchronous>, transform_indices = @transform_4, window_bounds = array<i64: 128, 128>}, {pipeline_mode = #tpu.pipeline_mode<synchronous>, transform_indices = @transform_5, window_bounds = array<i64: 32, 128>}]} {
    %cst = arith.constant 0.000000e+00 : f32
    %0 = vector.broadcast %cst : f32 to vector<2x18x64xf32>
    %c0 = arith.constant 0 : index
    %c0_0 = arith.constant 0 : index
    %c0_1 = arith.constant 0 : index
    %1 = vector.load %arg7[%c0, %c0_0, %c0_1] : memref<2x18x64xf32, #tpu.memory_space<vmem>>, vector<2x18x64xf32>
    tpu.vector_store %arg7[%c0, %c0_0, %c0_1], %0 {strides = array<i32>} : memref<2x18x64xf32, #tpu.memory_space<vmem>>, vector<2x18x64xf32>,
    %c0_2 = arith.constant 0 : index
    %c0_3 = arith.constant 0 : index
    %c0_4 = arith.constant 0 : index
    %2 = vector.load %arg1[%c0_2, %c0_3, %c0_4] : memref<2x16x64xf32, #tpu.memory_space<vmem>>, vector<2x16x64xf32>
    %c0_5 = arith.constant 0 : index
    %c1 = arith.constant 1 : index
    %c0_6 = arith.constant 0 : index
    %3 = vector.load %arg7[%c0_5, %c1, %c0_6] : memref<2x18x64xf32, #tpu.memory_space<vmem>>, vector<2x16x64xf32>
    tpu.vector_store %arg7[%c0_5, %c1, %c0_6], %2 {strides = array<i32>} : memref<2x18x64xf32, #tpu.memory_space<vmem>>, vector<2x16x64xf32>,
    %cst_7 = arith.constant 0.000000e+00 : f32
    %4 = vector.broadcast %cst_7 : f32 to vector<32x128xf32>
    %c0_8 = arith.constant 0 : index
    %c0_9 = arith.constant 0 : index
    %c0_10 = arith.constant 0 : index
    %5 = vector.load %arg7[%c0_8, %c0_9, %c0_10] : memref<2x18x64xf32, #tpu.memory_space<vmem>>, vector<2x16x64xf32>
    %6 = vector.shape_cast %5 : vector<2x16x64xf32> to vector<32x64xf32>
    %c0_11 = arith.constant 0 : index
    %c0_12 = arith.constant 0 : index
    %c0_13 = arith.constant 0 : index
    %7 = vector.load %arg2[%c0_11, %c0_12, %c0_13] : memref<3x64x128xf32, #tpu.memory_space<vmem>>, vector<1x64x128xf32>
    %8 = vector.shape_cast %7 : vector<1x64x128xf32> to vector<64x128xf32>
    %cst_14 = arith.constant dense<0.000000e+00> : vector<32x128xf32>
    %9 = tpu.matmul %6, %8, %cst_14 {dimension_numbers = #tpu.dot_dimension_numbers<[1], [0], [0], [1], [0, 0, 1, 1], [], []>} : vector<32x64xf32>, vector<64x128xf32>, vector<32x128xf32> -> vector<32x128xf32>
    %10 = arith.addf %4, %9 : vector<32x128xf32>
    %c0_15 = arith.constant 0 : index
    %c1_16 = arith.constant 1 : index
    %c0_17 = arith.constant 0 : index
    %11 = vector.load %arg7[%c0_15, %c1_16, %c0_17] : memref<2x18x64xf32, #tpu.memory_space<vmem>>, vector<2x16x64xf32>
    %12 = vector.shape_cast %11 : vector<2x16x64xf32> to vector<32x64xf32>
    %c1_18 = arith.constant 1 : index
    %c0_19 = arith.constant 0 : index
    %c0_20 = arith.constant 0 : index
    %13 = vector.load %arg2[%c1_18, %c0_19, %c0_20] : memref<3x64x128xf32, #tpu.memory_space<vmem>>, vector<1x64x128xf32>
    %14 = vector.shape_cast %13 : vector<1x64x128xf32> to vector<64x128xf32>
    %cst_21 = arith.constant dense<0.000000e+00> : vector<32x128xf32>
    %15 = tpu.matmul %12, %14, %cst_21 {dimension_numbers = #tpu.dot_dimension_numbers<[1], [0], [0], [1], [0, 0, 1, 1], [], []>} : vector<32x64xf32>, vector<64x128xf32>, vector<32x128xf32> -> vector<32x128xf32>
    %16 = arith.addf %10, %15 : vector<32x128xf32>
    %c0_22 = arith.constant 0 : index
    %c2 = arith.constant 2 : index
    %c0_23 = arith.constant 0 : index
    %17 = vector.load %arg7[%c0_22, %c2, %c0_23] : memref<2x18x64xf32, #tpu.memory_space<vmem>>, vector<2x16x64xf32>
    %18 = vector.shape_cast %17 : vector<2x16x64xf32> to vector<32x64xf32>
    %c2_24 = arith.constant 2 : index
    %c0_25 = arith.constant 0 : index
    %c0_26 = arith.constant 0 : index
    %19 = vector.load %arg2[%c2_24, %c0_25, %c0_26] : memref<3x64x128xf32, #tpu.memory_space<vmem>>, vector<1x64x128xf32>
    %20 = vector.shape_cast %19 : vector<1x64x128xf32> to vector<64x128xf32>
    %cst_27 = arith.constant dense<0.000000e+00> : vector<32x128xf32>
    %21 = tpu.matmul %18, %20, %cst_27 {dimension_numbers = #tpu.dot_dimension_numbers<[1], [0], [0], [1], [0, 0, 1, 1], [], []>} : vector<32x64xf32>, vector<64x128xf32>, vector<32x128xf32> -> vector<32x128xf32>
    %22 = arith.addf %16, %21 : vector<32x128xf32>
    %c0_28 = arith.constant 0 : index
    %c0_29 = arith.constant 0 : index
    %23 = vector.load %arg5[%c0_28, %c0_29] : memref<128x128xf32, #tpu.memory_space<vmem>>, vector<128x128xf32>
    %c0_30 = arith.constant 0 : index
    %c0_31 = arith.constant 0 : index
    %24 = vector.load %arg4[%c0_30, %c0_31] : memref<4x128xf32, #tpu.memory_space<vmem>>, vector<1x128xf32>
    %c1_32 = arith.constant 1 : index
    %c0_33 = arith.constant 0 : index
    %25 = vector.load %arg4[%c1_32, %c0_33] : memref<4x128xf32, #tpu.memory_space<vmem>>, vector<1x128xf32>
    %cst_34 = arith.constant dense<0.000000e+00> : vector<128xf32>
    %26 = vector.multi_reduction <add>, %22, %cst_34 [0] : vector<32x128xf32> to vector<128xf32>
    %27 = vector.shape_cast %26 : vector<128xf32> to vector<1x128xf32>
    %cst_35 = arith.constant dense<0.000000e+00> : vector<1x128xf32>
    %28 = tpu.matmul %27, %23, %cst_35 {dimension_numbers = #tpu.dot_dimension_numbers<[1], [0], [0], [1], [0, 0, 1, 1], [], []>} : vector<1x128xf32>, vector<128x128xf32>, vector<1x128xf32> -> vector<1x128xf32>
    %29 = vector.broadcast %28 : vector<1x128xf32> to vector<32x128xf32>
    %30 = arith.subf %22, %29 : vector<32x128xf32>
    %31 = arith.mulf %30, %30 : vector<32x128xf32>
    %cst_36 = arith.constant dense<0.000000e+00> : vector<128xf32>
    %32 = vector.multi_reduction <add>, %31, %cst_36 [0] : vector<32x128xf32> to vector<128xf32>
    %33 = vector.shape_cast %32 : vector<128xf32> to vector<1x128xf32>
    %cst_37 = arith.constant dense<0.000000e+00> : vector<1x128xf32>
    %34 = tpu.matmul %33, %23, %cst_37 {dimension_numbers = #tpu.dot_dimension_numbers<[1], [0], [0], [1], [0, 0, 1, 1], [], []>} : vector<1x128xf32>, vector<128x128xf32>, vector<1x128xf32> -> vector<1x128xf32>
    %cst_38 = arith.constant 9.99999974E-6 : f32
    %35 = vector.broadcast %cst_38 : f32 to vector<1x128xf32>
    %36 = arith.addf %34, %35 : vector<1x128xf32>
    %37 = math.rsqrt %36 : vector<1x128xf32>
    %38 = arith.mulf %24, %37 : vector<1x128xf32>
    %39 = vector.broadcast %38 : vector<1x128xf32> to vector<32x128xf32>
    %40 = arith.mulf %30, %39 : vector<32x128xf32>
    %41 = vector.broadcast %25 : vector<1x128xf32> to vector<32x128xf32>
    %42 = arith.addf %40, %41 : vector<32x128xf32>
    %cst_39 = arith.constant 0.000000e+00 : f32
    %43 = vector.broadcast %cst_39 : f32 to vector<32x128xf32>
    %44 = arith.maximumf %42, %43 : vector<32x128xf32>
    %cst_40 = arith.constant 0.000000e+00 : f32
    %45 = vector.broadcast %cst_40 : f32 to vector<2x18x128xf32>
    %c0_41 = arith.constant 0 : index
    %c0_42 = arith.constant 0 : index
    %c0_43 = arith.constant 0 : index
    %46 = vector.load %arg8[%c0_41, %c0_42, %c0_43] : memref<2x18x128xf32, #tpu.memory_space<vmem>>, vector<2x18x128xf32>
    tpu.vector_store %arg8[%c0_41, %c0_42, %c0_43], %45 {strides = array<i32>} : memref<2x18x128xf32, #tpu.memory_space<vmem>>, vector<2x18x128xf32>,
    %47 = vector.shape_cast %44 : vector<32x128xf32> to vector<2x16x128xf32>
    %c0_44 = arith.constant 0 : index
    %c1_45 = arith.constant 1 : index
    %c0_46 = arith.constant 0 : index
    %48 = vector.load %arg8[%c0_44, %c1_45, %c0_46] : memref<2x18x128xf32, #tpu.memory_space<vmem>>, vector<2x16x128xf32>
    tpu.vector_store %arg8[%c0_44, %c1_45, %c0_46], %47 {strides = array<i32>} : memref<2x18x128xf32, #tpu.memory_space<vmem>>, vector<2x16x128xf32>,
    %cst_47 = arith.constant 0.000000e+00 : f32
    %49 = vector.broadcast %cst_47 : f32 to vector<32x128xf32>
    %c0_48 = arith.constant 0 : index
    %c0_49 = arith.constant 0 : index
    %c0_50 = arith.constant 0 : index
    %50 = vector.load %arg8[%c0_48, %c0_49, %c0_50] : memref<2x18x128xf32, #tpu.memory_space<vmem>>, vector<2x16x128xf32>
    %51 = vector.shape_cast %50 : vector<2x16x128xf32> to vector<32x128xf32>
    %c0_51 = arith.constant 0 : index
    %c0_52 = arith.constant 0 : index
    %c0_53 = arith.constant 0 : index
    %52 = vector.load %arg3[%c0_51, %c0_52, %c0_53] : memref<3x128x128xf32, #tpu.memory_space<vmem>>, vector<1x128x128xf32>
    %53 = vector.shape_cast %52 : vector<1x128x128xf32> to vector<128x128xf32>
    %cst_54 = arith.constant dense<0.000000e+00> : vector<32x128xf32>
    %54 = tpu.matmul %51, %53, %cst_54 {dimension_numbers = #tpu.dot_dimension_numbers<[1], [0], [0], [1], [0, 0, 1, 1], [], []>} : vector<32x128xf32>, vector<128x128xf32>, vector<32x128xf32> -> vector<32x128xf32>
    %55 = arith.addf %49, %54 : vector<32x128xf32>
    %c0_55 = arith.constant 0 : index
    %c1_56 = arith.constant 1 : index
    %c0_57 = arith.constant 0 : index
    %56 = vector.load %arg8[%c0_55, %c1_56, %c0_57] : memref<2x18x128xf32, #tpu.memory_space<vmem>>, vector<2x16x128xf32>
    %57 = vector.shape_cast %56 : vector<2x16x128xf32> to vector<32x128xf32>
    %c1_58 = arith.constant 1 : index
    %c0_59 = arith.constant 0 : index
    %c0_60 = arith.constant 0 : index
    %58 = vector.load %arg3[%c1_58, %c0_59, %c0_60] : memref<3x128x128xf32, #tpu.memory_space<vmem>>, vector<1x128x128xf32>
    %59 = vector.shape_cast %58 : vector<1x128x128xf32> to vector<128x128xf32>
    %cst_61 = arith.constant dense<0.000000e+00> : vector<32x128xf32>
    %60 = tpu.matmul %57, %59, %cst_61 {dimension_numbers = #tpu.dot_dimension_numbers<[1], [0], [0], [1], [0, 0, 1, 1], [], []>} : vector<32x128xf32>, vector<128x128xf32>, vector<32x128xf32> -> vector<32x128xf32>
    %61 = arith.addf %55, %60 : vector<32x128xf32>
    %c0_62 = arith.constant 0 : index
    %c2_63 = arith.constant 2 : index
    %c0_64 = arith.constant 0 : index
    %62 = vector.load %arg8[%c0_62, %c2_63, %c0_64] : memref<2x18x128xf32, #tpu.memory_space<vmem>>, vector<2x16x128xf32>
    %63 = vector.shape_cast %62 : vector<2x16x128xf32> to vector<32x128xf32>
    %c2_65 = arith.constant 2 : index
    %c0_66 = arith.constant 0 : index
    %c0_67 = arith.constant 0 : index
    %64 = vector.load %arg3[%c2_65, %c0_66, %c0_67] : memref<3x128x128xf32, #tpu.memory_space<vmem>>, vector<1x128x128xf32>
    %65 = vector.shape_cast %64 : vector<1x128x128xf32> to vector<128x128xf32>
    %cst_68 = arith.constant dense<0.000000e+00> : vector<32x128xf32>
    %66 = tpu.matmul %63, %65, %cst_68 {dimension_numbers = #tpu.dot_dimension_numbers<[1], [0], [0], [1], [0, 0, 1, 1], [], []>} : vector<32x128xf32>, vector<128x128xf32>, vector<32x128xf32> -> vector<32x128xf32>
    %67 = arith.addf %61, %66 : vector<32x128xf32>
    %c0_69 = arith.constant 0 : index
    %c0_70 = arith.constant 0 : index
    %68 = vector.load %arg5[%c0_69, %c0_70] : memref<128x128xf32, #tpu.memory_space<vmem>>, vector<128x128xf32>
    %c2_71 = arith.constant 2 : index
    %c0_72 = arith.constant 0 : index
    %69 = vector.load %arg4[%c2_71, %c0_72] : memref<4x128xf32, #tpu.memory_space<vmem>>, vector<1x128xf32>
    %c3 = arith.constant 3 : index
    %c0_73 = arith.constant 0 : index
    %70 = vector.load %arg4[%c3, %c0_73] : memref<4x128xf32, #tpu.memory_space<vmem>>, vector<1x128xf32>
    %cst_74 = arith.constant dense<0.000000e+00> : vector<128xf32>
    %71 = vector.multi_reduction <add>, %67, %cst_74 [0] : vector<32x128xf32> to vector<128xf32>
    %72 = vector.shape_cast %71 : vector<128xf32> to vector<1x128xf32>
    %cst_75 = arith.constant dense<0.000000e+00> : vector<1x128xf32>
    %73 = tpu.matmul %72, %68, %cst_75 {dimension_numbers = #tpu.dot_dimension_numbers<[1], [0], [0], [1], [0, 0, 1, 1], [], []>} : vector<1x128xf32>, vector<128x128xf32>, vector<1x128xf32> -> vector<1x128xf32>
    %74 = vector.broadcast %73 : vector<1x128xf32> to vector<32x128xf32>
    %75 = arith.subf %67, %74 : vector<32x128xf32>
    %76 = arith.mulf %75, %75 : vector<32x128xf32>
    %cst_76 = arith.constant dense<0.000000e+00> : vector<128xf32>
    %77 = vector.multi_reduction <add>, %76, %cst_76 [0] : vector<32x128xf32> to vector<128xf32>
    %78 = vector.shape_cast %77 : vector<128xf32> to vector<1x128xf32>
    %cst_77 = arith.constant dense<0.000000e+00> : vector<1x128xf32>
    %79 = tpu.matmul %78, %68, %cst_77 {dimension_numbers = #tpu.dot_dimension_numbers<[1], [0], [0], [1], [0, 0, 1, 1], [], []>} : vector<1x128xf32>, vector<128x128xf32>, vector<1x128xf32> -> vector<1x128xf32>
    %cst_78 = arith.constant 9.99999974E-6 : f32
    %80 = vector.broadcast %cst_78 : f32 to vector<1x128xf32>
    %81 = arith.addf %79, %80 : vector<1x128xf32>
    %82 = math.rsqrt %81 : vector<1x128xf32>
    %83 = arith.mulf %69, %82 : vector<1x128xf32>
    %84 = vector.broadcast %83 : vector<1x128xf32> to vector<32x128xf32>
    %85 = arith.mulf %75, %84 : vector<32x128xf32>
    %86 = vector.broadcast %70 : vector<1x128xf32> to vector<32x128xf32>
    %87 = arith.addf %85, %86 : vector<32x128xf32>
    %cst_79 = arith.constant 0.000000e+00 : f32
    %88 = vector.broadcast %cst_79 : f32 to vector<32x128xf32>
    %89 = arith.maximumf %87, %88 : vector<32x128xf32>
    %c0_80 = arith.constant 0 : index
    %c0_81 = arith.constant 0 : index
    %90 = vector.load %arg6[%c0_80, %c0_81] : memref<32x128xf32, #tpu.memory_space<vmem>>, vector<32x128xf32>
    tpu.vector_store %arg6[%c0_80, %c0_81], %89 {strides = array<i32>} : memref<32x128xf32, #tpu.memory_space<vmem>>, vector<32x128xf32>,
    return
  }
  func.func @transform_0(%arg0: i32) -> (i32, i32, i32) {
    %c0_i32 = arith.constant 0 : i32
    %c0_i32_0 = arith.constant 0 : i32
    %c0_i32_1 = arith.constant 0 : i32
    %c0_i32_2 = arith.constant 0 : i32
    return %c0_i32, %c0_i32_0, %c0_i32_1 : i32, i32, i32
  }
  func.func @transform_1(%arg0: i32) -> (i32, i32, i32) {
    %c0_i32 = arith.constant 0 : i32
    %c0_i32_0 = arith.constant 0 : i32
    %c0_i32_1 = arith.constant 0 : i32
    %c0_i32_2 = arith.constant 0 : i32
    return %c0_i32, %c0_i32_0, %c0_i32_1 : i32, i32, i32
  }
  func.func @transform_2(%arg0: i32) -> (i32, i32, i32) {
    %c0_i32 = arith.constant 0 : i32
    %c0_i32_0 = arith.constant 0 : i32
    %c0_i32_1 = arith.constant 0 : i32
    %c0_i32_2 = arith.constant 0 : i32
    return %c0_i32, %c0_i32_0, %c0_i32_1 : i32, i32, i32
  }
  func.func @transform_3(%arg0: i32) -> (i32, i32) {
    %c0_i32 = arith.constant 0 : i32
    %c0_i32_0 = arith.constant 0 : i32
    %c0_i32_1 = arith.constant 0 : i32
    return %c0_i32, %c0_i32_0 : i32, i32
  }
  func.func @transform_4(%arg0: i32) -> (i32, i32) {
    %c0_i32 = arith.constant 0 : i32
    %c0_i32_0 = arith.constant 0 : i32
    %c0_i32_1 = arith.constant 0 : i32
    return %c0_i32, %c0_i32_0 : i32, i32
  }
  func.func @transform_5(%arg0: i32) -> (i32, i32) {
    %c0_i32 = arith.constant 0 : i32
    %c0_i32_0 = arith.constant 0 : i32
    %c0_i32_1 = arith.constant 0 : i32
    return %c0_i32, %c0_i32_0 : i32, i32
  }
}

</mosaic_0001>

<bundles_post_ra>
// kernel: tile.28
= control target key start
LH: loop header
LB: loop body
LE: loop exit
PB: predicated region body
PF: predicated region fallthrough
CT: control target
= control target key end

     0   :  { %s28_s0 = inlined_call_operand.vmem [shape: f32[8], index: 0, kind: input, shape index: {}]   ;;  %s29_s1 = inlined_call_operand.vmem [shape: f32[16,8], index: 1, kind: output, shape index: {}]  }
   0x1   :  { %v4_v0 = vld [vmem:[%s28_s0] ss:$0 sm:$0xff] }
   0x2   :  { %5 = vst [vmem:[%s29_s1] sm:$0xff] %v4_v0  ;;  %8 = vst [vmem:[%s29_s1 + $0x8] sm:$0xff] %v4_v0 }

// kernel: tile.41
= control target key start
LH: loop header
LB: loop body
LE: loop exit
PB: predicated region body
PF: predicated region fallthrough
CT: control target
= control target key end

     0   :  { %s133_s10 = smov 120   ;;  %s134_s11 = smov 104   ;;  %vm3_vm0 = vcmask 64512   ;;  %vm9_vm1 = vcmask 1048512   ;;  %vm15_vm2 = vcmask 982912   ;;  %vm21_vm3 = vcmask 917312   ;;  %s209_s0 = inlined_call_operand.vmem [shape: f32[16,8], index: 0, kind: input, shape index: {}]   ;;  %s210_s1 = inlined_call_operand.vmem [shape: f32[1,128], index: 1, kind: output, shape index: {}]  }
   0x1   :  { %v103_v0 = vld [vmem:[%s209_s0 + $0xf] sm:$0x1]   ;;  %v105_v1 = vld [vmem:[%s209_s0 + $0xd] sm:$0x1]   ;;  %v104_v2 = vld [vmem:[%s209_s0 + $0xe] sm:$0x1]  }
   0x2   :  { %7 = vrot.lane.b32.xlu0 %v103_v0, %s133_s10  ;;  %19 = vrot.lane.b32.xlu1 %v105_v1, %s134_s11  ;;  %v106_v3 = vld [vmem:[%s209_s0 + $0xc] sm:$0x1]   ;;  %s135_s16 = smov 112   ;;  %s136_s17 = smov 96   ;;  %v107_v4 = vld [vmem:[%s209_s0 + $0xb] sm:$0x1]  }
   0x3   :  { %v108_v5 = vld [vmem:[%s209_s0 + $0xa] sm:$0x1]   ;;  %v2_v6 = vld [vmem:[%s209_s0] sm:$0x1]   ;;  %s137_s24 = smov 88   ;;  %s138_s25 = smov 80  }
   0x4   :  { %4 = vst.msk [vmem:[#allocation0] sm:$0x1] %vm3_vm0, %v2_v6   ;;  %v109_v7 = vld [vmem:[%s209_s0 + $0x9] sm:$0x1]   ;;  %v110_v8 = vld [vmem:[%s209_s0 + $0x8] sm:$0x1]  }
   0x5   :  { %s139_s30 = smov 72   ;;  %s140_s2 = smov 64   ;;  %v111_v9 = vld [vmem:[%s209_s0 + $0x7] sm:$0x1]   ;;  %v112_v10 = vld [vmem:[%s209_s0 + $0x6] sm:$0x1]  }
   0x6   :  { %13 = vrot.lane.b32.xlu0 %v104_v2, %s135_s16  ;;  %25 = vrot.lane.b32.xlu1 %v106_v3, %s136_s17  ;;  %s141_s7 = smov 56   ;;  %s142_s8 = smov 48   ;;  %v113_v11 = vld [vmem:[%s209_s0 + $0x5] sm:$0x1]   ;;  %v114_v12 = vld [vmem:[%s209_s0 + $0x4] sm:$0x1]  }
   0x7   :  { %s143_s13 = smov 40   ;;  %s144_s14 = smov 32   ;;  %v115_v13 = vld [vmem:[%s209_s0 + $0x3] sm:$0x1]   ;;  %v116_v14 = vld [vmem:[%s209_s0 + $0x2] sm:$0x1]  }
   0x8   :  { %s145_s19 = smov 24   ;;  %s146_s20 = smov 16   ;;  %v117_v15 = vld [vmem:[%s209_s0 + $0x1] sm:$0x1]   ;;  %vm27_vm4 = vcmask 851712   ;;  %vm33_vm5 = vcmask 786112  }
   0x9   :  { %s147_s0 = smov 8   ;;  %vm39_vm6 = vcmask 720512   ;;  %vm45_vm7 = vcmask 654912   ;;  %vm51_vm8 = vcmask 589312   ;;  %vm57_vm9 = vcmask 523712  }
   0xa   :  { %31 = vrot.lane.b32.xlu0 %v107_v4, %s137_s24  ;;  %37 = vrot.lane.b32.xlu1 %v108_v5, %s138_s25  ;;  %vm63_vm10 = vcmask 458112   ;;  %vm69_vm11 = vcmask 392512   ;;  %vm75_vm12 = vcmask 326912   ;;  %vm81_vm13 = vcmask 261312  }
   0xb   :  { %vm87_vm14 = vcmask 195712   ;;  %vm93_vm15 = vcmask 130112  }
   0xe   :  { %43 = vrot.lane.b32.xlu0 %v109_v7, %s139_s30  ;;  %49 = vrot.lane.b32.xlu1 %v110_v8, %s140_s2 }
  0x12   :  { %55 = vrot.lane.b32.xlu0 %v111_v9, %s141_s7  ;;  %61 = vrot.lane.b32.xlu1 %v112_v10, %s142_s8 }
  0x16   :  { %67 = vrot.lane.b32.xlu0 %v113_v11, %s143_s13  ;;  %73 = vrot.lane.b32.xlu1 %v114_v12, %s144_s14 }
  0x1a   :  { %79 = vrot.lane.b32.xlu0 %v115_v13, %s145_s19  ;;  %85 = vrot.lane.b32.xlu1 %v116_v14, %s146_s20 }
  0x1e   :  { %91 = vrot.lane.b32.xlu0 %v117_v15, %s147_s0 }
  0x74   :  { %v8_v16 = vpop.permute.xlu0 %7   ;;  %v20_v17 = vpop.permute.xlu1 %19  }
  0x75   :  { %10 = vst.msk [vmem:[#allocation0] sm:$0x1] %vm9_vm1, %v8_v16  }
  0x78   :  { %v14_v18 = vpop.permute.xlu0 %13   ;;  %v26_v19 = vpop.permute.xlu1 %25  }
  0x79   :  { %16 = vst.msk [vmem:[#allocation0] sm:$0x1] %vm15_vm2, %v14_v18  }
  0x7a   :  { %22 = vst.msk [vmem:[#allocation0] sm:$0x1] %vm21_vm3, %v20_v17  }
  0x7b   :  { %28 = vst.msk [vmem:[#allocation0] sm:$0x1] %vm27_vm4, %v26_v19  }
  0x7c   :  { %v32_v20 = vpop.permute.xlu0 %31   ;;  %v38_v21 = vpop.permute.xlu1 %37  }
  0x7d   :  { %34 = vst.msk [vmem:[#allocation0] sm:$0x1] %vm33_vm5, %v32_v20  }
  0x7e   :  { %40 = vst.msk [vmem:[#allocation0] sm:$0x1] %vm39_vm6, %v38_v21  }
  0x80   :  { %v44_v22 = vpop.permute.xlu0 %43   ;;  %v50_v23 = vpop.permute.xlu1 %49  }
  0x81   :  { %46 = vst.msk [vmem:[#allocation0] sm:$0x1] %vm45_vm7, %v44_v22  }
  0x82   :  { %52 = vst.msk [vmem:[#allocation0] sm:$0x1] %vm51_vm8, %v50_v23  }
  0x84   :  { %v56_v24 = vpop.permute.xlu0 %55   ;;  %v62_v25 = vpop.permute.xlu1 %61  }
  0x85   :  { %58 = vst.msk [vmem:[#allocation0] sm:$0x1] %vm57_vm9, %v56_v24  }
  0x86   :  { %64 = vst.msk [vmem:[#allocation0] sm:$0x1] %vm63_vm10, %v62_v25  }
  0x88   :  { %v68_v26 = vpop.permute.xlu0 %67   ;;  %v74_v27 = vpop.permute.xlu1 %73  }
  0x89   :  { %70 = vst.msk [vmem:[#allocation0] sm:$0x1] %vm69_vm11, %v68_v26  }
  0x8a   :  { %76 = vst.msk [vmem:[#allocation0] sm:$0x1] %vm75_vm12, %v74_v27  }
  0x8c   :  { %v80_v28 = vpop.permute.xlu0 %79   ;;  %v86_v29 = vpop.permute.xlu1 %85  }
  0x8d   :  { %82 = vst.msk [vmem:[#allocation0] sm:$0x1] %vm81_vm13, %v80_v28  }
  0x8e   :  { %88 = vst.msk [vmem:[#allocation0] sm:$0x1] %vm87_vm14, %v86_v29  }
  0x90   :  { %v92_v30 = vpop.permute.xlu0 %91  }
  0x91   :  { %94 = vst.msk [vmem:[#allocation0] sm:$0x1] %vm93_vm15, %v92_v30  }
  0x98   :  { %v99_v31 = vld [vmem:[#allocation0] sm:$0x1] }
  0x99   :  { %102 = vst [vmem:[%s210_s1] sm:$0x1] %v99_v31 }

// kernel: down_block.1
= control target key start
LH: loop header
LB: loop body
LE: loop exit
PB: predicated region body
PF: predicated region fallthrough
CT: control target
= control target key end

     0   :  { %vm20_vm0 = vcmask 523264   ;;  %vm23_vm1 = vcmask 517120   ;;  %v1680_v3 = vmov 0.0   ;;  %vm1681_vm2 = vmmov 0   ;;  %s2240_s1 = inlined_call_operand.vmem [shape: f32[3,64,128], index: 1, kind: input, shape index: {}]   ;;  %s2241_s0 = inlined_call_operand.vmem [shape: f32[2,16,64], index: 0, kind: input, shape index: {}]   ;;  %s2242_s4 = inlined_call_operand.vmem [shape: f32[128,128], index: 4, kind: input, shape index: {}]   ;;  %s2243_s2 = inlined_call_operand.vmem [shape: f32[3,128,128], index: 2, kind: input, shape index: {}]   ;;  %s2244_s3 = inlined_call_operand.vmem [shape: f32[4,128], index: 3, kind: input, shape index: {}]   ;;  %s2245_s5 = inlined_call_operand.vmem [shape: f32[32,128], index: 5, kind: output, shape index: {}]  }
   0x1   :  { %v1135_v0 = vld [vmem:[%s2240_s1 + $0x78] sm:$0xff]  ;;  %v1134_v2 = vld [vmem:[%s2240_s1 + $0x70] sm:$0xff]  ;;  %21 = vst.msk [vmem:[#allocation2] sm:$0xff] %vm20_vm0, %v1680_v3  ;;  %22 = vst.msk [vmem:[#allocation2 + $0x8] sm:$0xff] %vm20_vm0, %v1680_v3 }
   0x2   :  { %v47_v1 = vld [vmem:[%s2240_s1 + $0x38] sm:$0xff]  ;;  %25 = vst.msk [vmem:[#allocation2 + $0x18] sm:$0xff] %vm20_vm0, %v1680_v3  ;;  %26 = vst.msk [vmem:[#allocation2 + $0x20] sm:$0xff] %vm20_vm0, %v1680_v3  ;;  %1354 = vmatprep.subr.mxu0 %v1135_v0  ;;  %v46_v4 = vld [vmem:[%s2240_s1 + $0x30] sm:$0xff] }
   0x3   :  { %579 = vst [vmem:[#allocation3] sm:$0xff] %v1680_v3  ;;  %580 = vst [vmem:[#allocation3 + $0x8] sm:$0xff] %v1680_v3  ;;  %1376 = vmatprep.subr.mxu1 %v47_v1  ;;  %1355 = vmatpush3.msra.mxu0 %v1135_v0  ;;  %v1133_v5 = vld [vmem:[%s2240_s1 + $0x68] sm:$0xff]  ;;  %v1132_v7 = vld [vmem:[%s2240_s1 + $0x60] sm:$0xff] }
   0x4   :  { %581 = vst [vmem:[#allocation3 + $0x10] sm:$0x3] %v1680_v3  ;;  %582 = vst [vmem:[#allocation3 + $0x18] sm:$0xff] %v1680_v3  ;;  %1377 = vmatpush3.msra.mxu1 %v47_v1  ;;  %v45_v6 = vld [vmem:[%s2240_s1 + $0x28] sm:$0xff]  ;;  %1356 = vmatprep.subr.mxu0 %v1134_v2  ;;  %v44_v8 = vld [vmem:[%s2240_s1 + $0x20] sm:$0xff] }
   0x5   :  { %583 = vst [vmem:[#allocation3 + $0x20] sm:$0xff] %v1680_v3  ;;  %584 = vst [vmem:[#allocation3 + $0x28] sm:$0x3] %v1680_v3  ;;  %1378 = vmatprep.subr.mxu1 %v46_v4  ;;  %1357 = vmatpush3.msra.mxu0 %v1134_v2  ;;  %v28_v9 = vld [vmem:[%s2241_s0] sm:$0xff]  ;;  %v29_v10 = vld [vmem:[%s2241_s0 + $0x8] sm:$0xff] }
   0x6   :  { %24 = vst.msk [vmem:[#allocation2 + $0x10] sm:$0x3] %vm23_vm1, %v1680_v3  ;;  %27 = vst.msk [vmem:[#allocation2 + $0x28] sm:$0x3] %vm23_vm1, %v1680_v3  ;;  %1379 = vmatpush3.msra.mxu1 %v46_v4  ;;  %1358 = vmatprep.subr.mxu0 %v1133_v5  ;;  %v1131_v11 = vld [vmem:[%s2240_s1 + $0x58] sm:$0xff]  ;;  %v30_v13 = vld [vmem:[%s2241_s0 + $0x10] sm:$0xff] }
   0x7   :  { %1380 = vmatprep.subr.mxu1 %v45_v6  ;;  %1359 = vmatpush3.msra.mxu0 %v1133_v5  ;;  %v43_v12 = vld [vmem:[%s2240_s1 + $0x18] sm:$0xff]  ;;  %32 = vst.msk [vmem:[#allocation2 + $0x1] sm:$0xff] %vm20_vm0, %v28_v9  ;;  %33 = vst.msk [vmem:[#allocation2 + $0x9] sm:$0xff] %vm20_vm0, %v29_v10  ;;  %v1130_v14 = vld [vmem:[%s2240_s1 + $0x50] sm:$0xff] }
   0x8   :  { %1381 = vmatpush3.msra.mxu1 %v45_v6  ;;  %1360 = vmatprep.subr.mxu0 %v1132_v7  ;;  %v42_v15 = vld [vmem:[%s2240_s1 + $0x10] sm:$0xff]  ;;  %34 = vst.msk [vmem:[#allocation2 + $0x19] sm:$0xff] %vm20_vm0, %v30_v13  ;;  %v31_v16 = vld [vmem:[%s2241_s0 + $0x18] sm:$0xff]  ;;  %v1129_v17 = vld [vmem:[%s2240_s1 + $0x48] sm:$0xff] }
   0x9   :  { %1382 = vmatprep.subr.mxu1 %v44_v8  ;;  %1361 = vmatpush3.msra.mxu0 %v1132_v7  ;;  %35 = vst.msk [vmem:[#allocation2 + $0x21] sm:$0xff] %vm20_vm0, %v31_v16  ;;  %v41_v18 = vld [vmem:[%s2240_s1 + $0x8] sm:$0xff]  ;;  %v1128_v19 = vld [vmem:[%s2240_s1 + $0x40] sm:$0xff]  ;;  %v1151_v25 = vld [vmem:[%s2240_s1 + $0xb8] sm:$0xff] }
   0xa   :  { %1383 = vmatpush3.msra.mxu1 %v44_v8  ;;  %1362 = vmatprep.subr.mxu0 %v1131_v11  ;;  %v40_v20 = vld [vmem:[%s2240_s1] sm:$0xff]  ;;  %v1150_v28 = vld [vmem:[%s2240_s1 + $0xb0] sm:$0xff]  ;;  %v1149_v30 = vld [vmem:[%s2240_s1 + $0xa8] sm:$0xff] }
   0xb   :  { %1384 = vmatprep.subr.mxu1 %v43_v12  ;;  %1363 = vmatpush3.msra.mxu0 %v1131_v11  ;;  %v1148_v33 = vld [vmem:[%s2240_s1 + $0xa0] sm:$0xff]  ;;  %v1147_v34 = vld [vmem:[%s2240_s1 + $0x98] sm:$0xff]  ;;  %v1146_v35 = vld [vmem:[%s2240_s1 + $0x90] sm:$0xff] }
   0xc   :  { %1385 = vmatpush3.msra.mxu1 %v43_v12  ;;  %1364 = vmatprep.subr.mxu0 %v1130_v14  ;;  %v1145_v36 = vld [vmem:[%s2240_s1 + $0x88] sm:$0xff]  ;;  %v1144_v37 = vld [vmem:[%s2240_s1 + $0x80] sm:$0xff]  ;;  %v1835_v41 = vld [vmem:[%s2242_s4 + $0x78] sm:$0xff] }
   0xd   :  { %1386 = vmatprep.subr.mxu1 %v42_v15  ;;  %1365 = vmatpush3.msra.mxu0 %v1130_v14  ;;  %v1841_v42 = vld [vmem:[%s2242_s4 + $0x70] sm:$0xff]  ;;  %v1848_v43 = vld [vmem:[%s2242_s4 + $0x68] sm:$0xff]  ;;  %v1862_v44 = vld [vmem:[%s2242_s4 + $0x60] sm:$0xff] }
   0xe   :  { %1387 = vmatpush3.msra.mxu1 %v42_v15  ;;  %1366 = vmatprep.subr.mxu0 %v1129_v17  ;;  %v48_v21 = vld [vmem:[#allocation2 + $0x1] sm:$0xff]  ;;  %v49_v23 = vld [vmem:[#allocation2 + $0x9] sm:$0xff]  ;;  %v1870_v45 = vld [vmem:[%s2242_s4 + $0x58] sm:$0xff] }
   0xf   :  { %1388 = vmatprep.subr.mxu1 %v41_v18  ;;  %1367 = vmatpush3.msra.mxu0 %v1129_v17  ;;  %v36_v22 = vld [vmem:[#allocation2] sm:$0xff]  ;;  %v37_v24 = vld [vmem:[#allocation2 + $0x8] sm:$0xff]  ;;  %v38_v27 = vld [vmem:[#allocation2 + $0x18] sm:$0xff] }
  0x10   :  { %1389 = vmatpush3.msra.mxu1 %v41_v18  ;;  %1368 = vmatprep.subr.mxu0 %v1128_v19  ;;  %v50_v26 = vld [vmem:[#allocation2 + $0x19] sm:$0xff]  ;;  %v51_v31 = vld [vmem:[#allocation2 + $0x21] sm:$0xff]  ;;  %v256_v38 = vld [vmem:[#allocation2 + $0xa] sm:$0xff] }
  0x11   :  { %1390 = vmatprep.subr.mxu1 %v40_v20  ;;  %1369 = vmatpush3.msra.mxu0 %v1128_v19  ;;  %v39_v29 = vld [vmem:[#allocation2 + $0x20] sm:$0xff]  ;;  %v1879_v46 = vld [vmem:[%s2242_s4 + $0x50] sm:$0xff]  ;;  %v1888_v47 = vld [vmem:[%s2242_s4 + $0x48] sm:$0xff] }
  0x12   :  { %1370 = vmatprep.mubr.msk.f32.mxu0 %vm20_vm0, %v48_v21  ;;  %1391 = vmatpush3.msra.mxu1 %v40_v20  ;;  %v255_v32 = vld [vmem:[#allocation2 + $0x2] sm:$0xff]  ;;  %v257_v39 = vld [vmem:[#allocation2 + $0x1a] sm:$0xff]  ;;  %v1915_v50 = vld [vmem:[%s2242_s4 + $0x30] sm:$0xff] }
  0x13   :  { %1392 = vmatprep.mubr.msk.f32.mxu1 %vm20_vm0, %v36_v22  ;;  %1371 = vmatmul.mubr.msk.f32.vlgmr.msra.gmra.mxu0 %vm20_vm0, %v49_v23  ;;  %v258_v40 = vld [vmem:[#allocation2 + $0x22] sm:$0xff]  ;;  %v1906_v49 = vld [vmem:[%s2242_s4 + $0x38] sm:$0xff]  ;;  %v1951_v54 = vld [vmem:[%s2242_s4 + $0x10] sm:$0xff]  ;;  %v466_v23 = vlaneseq }
  0x14   :  { %1393 = vmatmul.mubr.msk.f32.vlgmr.msra.gmra.mxu1 %vm20_vm0, %v37_v24  ;;  %1398 = vmatprep.subr.mxu0 %v1151_v25  ;;  %v1897_v48 = vld [vmem:[%s2242_s4 + $0x40] sm:$0xff]  ;;  %v1924_v51 = vld [vmem:[%s2242_s4 + $0x28] sm:$0xff]  ;;  %v1942_v53 = vld [vmem:[%s2242_s4 + $0x18] sm:$0xff] }
  0x15   :  { %1373 = vmatprep.mubr.msk.f32.mxu0 %vm20_vm0, %v50_v26  ;;  %1399 = vmatpush3.msra.mxu0 %v1151_v25  ;;  %v1933_v52 = vld [vmem:[%s2242_s4 + $0x20] sm:$0xff]  ;;  %v1960_v55 = vld [vmem:[%s2242_s4 + $0x8] sm:$0xff]  ;;  %v467_v24 = vshrl.u32 %v466_v23, 7 }
  0x16   :  { %1395 = vmatprep.mubr.msk.f32.mxu1 %vm20_vm0, %v38_v27  ;;  %1400 = vmatprep.subr.mxu0 %v1150_v28  ;;  %v1969_v56 = vld [vmem:[%s2242_s4] sm:$0xff]  ;;  %v1158_v23 = vld [vmem:[%s2243_s2 + $0x88] sm:$0xff] }
  0x17   :  { %1420 = vmatprep.subr.mxu1 %v1680_v3  ;;  %1401 = vmatpush3.msra.mxu0 %v1150_v28  ;;  %v1978_v25 = vsub.s32 0, %v467_v24  ;;  %v598_v24 = vld [vmem:[%s2243_s2 + $0x28] sm:$0xff] }
  0x18   :  { %1396 = vmatmul.mubr.msk.f32.gmra.mxu1 %vm20_vm0, %v39_v29  ;;  %1402 = vmatprep.subr.mxu0 %v1149_v30 }
  0x19   :  { %1374 = vmatmul.mubr.msk.f32.gmra.mxu0 %vm20_vm0, %v51_v31  ;;  %1421 = vmatpush3.msra.mxu1 %v1835_v41 }
  0x1a   :  { %1403 = vmatpush3.msra.mxu0 %v1149_v30  ;;  %1414 = vmatprep.mubr.msk.f32.mxu0 %vm20_vm0, %v255_v32 }
  0x1b   :  { %1404 = vmatprep.subr.mxu0 %v1148_v33  ;;  %1422 = vmatprep.subr.mxu1 %v1680_v3 }
  0x1c   :  { %1405 = vmatpush3.msra.mxu0 %v1148_v33  ;;  %1423 = vmatpush3.msra.mxu1 %v1841_v42 }
  0x1d   :  { %1406 = vmatprep.subr.mxu0 %v1147_v34  ;;  %1424 = vmatprep.subr.mxu1 %v1680_v3 }
  0x1e   :  { %1407 = vmatpush3.msra.mxu0 %v1147_v34  ;;  %1425 = vmatpush3.msra.mxu1 %v1848_v43 }
  0x1f   :  { %1408 = vmatprep.subr.mxu0 %v1146_v35  ;;  %1426 = vmatprep.subr.mxu1 %v1680_v3 }
  0x20   :  { %1409 = vmatpush3.msra.mxu0 %v1146_v35  ;;  %1427 = vmatpush3.msra.mxu1 %v1862_v44 }
  0x21   :  { %1410 = vmatprep.subr.mxu0 %v1145_v36  ;;  %1428 = vmatprep.subr.mxu1 %v1680_v3 }
  0x22   :  { %1411 = vmatpush3.msra.mxu0 %v1145_v36  ;;  %1429 = vmatpush3.msra.mxu1 %v1870_v45 }
  0x23   :  { %1412 = vmatprep.subr.mxu0 %v1144_v37  ;;  %1430 = vmatprep.subr.mxu1 %v1680_v3 }
  0x24   :  { %1413 = vmatpush3.msra.mxu0 %v1144_v37  ;;  %1431 = vmatpush3.msra.mxu1 %v1879_v46 }
  0x25   :  { %1415 = vmatmul.mubr.msk.f32.vlgmr.msra.gmra.mxu0 %vm20_vm0, %v256_v38  ;;  %1455 = vmatprep.subr.mxu0 %v1680_v3 }
  0x26   :  { %1417 = vmatprep.mubr.msk.f32.mxu0 %vm20_vm0, %v257_v39  ;;  %1456 = vmatpush3.msra.mxu0 %v1835_v41 }
  0x27   :  { %1457 = vmatprep.subr.mxu0 %v1680_v3  ;;  %1432 = vmatprep.subr.mxu1 %v1680_v3 }
  0x28   :  { %1458 = vmatpush3.msra.mxu0 %v1841_v42  ;;  %1433 = vmatpush3.msra.mxu1 %v1888_v47 }
  0x29   :  { %1418 = vmatmul.mubr.msk.f32.gmra.mxu0 %vm20_vm0, %v258_v40  ;;  %1459 = vmatprep.subr.mxu0 %v1680_v3 }
  0x2a   :  { %1460 = vmatpush3.msra.mxu0 %v1848_v43  ;;  %1434 = vmatprep.subr.mxu1 %v1680_v3 }
  0x2b   :  { %1461 = vmatprep.subr.mxu0 %v1680_v3  ;;  %1435 = vmatpush3.msra.mxu1 %v1897_v48 }
  0x2c   :  { %1462 = vmatpush3.msra.mxu0 %v1862_v44  ;;  %1436 = vmatprep.subr.mxu1 %v1680_v3 }
  0x2d   :  { %1463 = vmatprep.subr.mxu0 %v1680_v3  ;;  %1437 = vmatpush3.msra.mxu1 %v1906_v49 }
  0x2e   :  { %1464 = vmatpush3.msra.mxu0 %v1870_v45  ;;  %1438 = vmatprep.subr.mxu1 %v1680_v3 }
  0x2f   :  { %1465 = vmatprep.subr.mxu0 %v1680_v3  ;;  %1439 = vmatpush3.msra.mxu1 %v1915_v50 }
  0x30   :  { %1466 = vmatpush3.msra.mxu0 %v1879_v46  ;;  %1440 = vmatprep.subr.mxu1 %v1680_v3 }
  0x31   :  { %1467 = vmatprep.subr.mxu0 %v1680_v3  ;;  %1441 = vmatpush3.msra.mxu1 %v1924_v51 }
  0x32   :  { %1468 = vmatpush3.msra.mxu0 %v1888_v47  ;;  %1442 = vmatprep.subr.mxu1 %v1680_v3 }
  0x33   :  { %1469 = vmatprep.subr.mxu0 %v1680_v3  ;;  %1443 = vmatpush3.msra.mxu1 %v1933_v52 }
  0x34   :  { %1470 = vmatpush3.msra.mxu0 %v1897_v48  ;;  %1444 = vmatprep.subr.mxu1 %v1680_v3 }
  0x35   :  { %1471 = vmatprep.subr.mxu0 %v1680_v3  ;;  %1445 = vmatpush3.msra.mxu1 %v1942_v53 }
  0x36   :  { %1472 = vmatpush3.msra.mxu0 %v1906_v49  ;;  %1446 = vmatprep.subr.mxu1 %v1680_v3 }
  0x37   :  { %1473 = vmatprep.subr.mxu0 %v1680_v3  ;;  %1447 = vmatpush3.msra.mxu1 %v1951_v54 }
  0x38   :  { %1474 = vmatpush3.msra.mxu0 %v1915_v50  ;;  %1448 = vmatprep.subr.mxu1 %v1680_v3 }
  0x39   :  { %1475 = vmatprep.subr.mxu0 %v1680_v3  ;;  %1449 = vmatpush3.msra.mxu1 %v1960_v55 }
  0x3a   :  { %1476 = vmatpush3.msra.mxu0 %v1924_v51  ;;  %1450 = vmatprep.subr.mxu1 %v1680_v3 }
  0x3b   :  { %1477 = vmatprep.subr.mxu0 %v1680_v3  ;;  %1451 = vmatpush3.msra.mxu1 %v1969_v56 }
  0x3c   :  { %1478 = vmatpush3.msra.mxu0 %v1933_v52  ;;  %1452 = vmatprep.mubr.msk.f32.mxu1 %vm1681_vm2, %v1680_v3 }
  0x3d   :  { %1479 = vmatprep.subr.mxu0 %v1680_v3  ;;  %1487 = vmatprep.mubr.msk.f32.mxu0 %vm1681_vm2, %v1680_v3 }
  0x3e   :  { %1480 = vmatpush3.msra.mxu0 %v1942_v53 }
  0x3f   :  { %1481 = vmatprep.subr.mxu0 %v1680_v3 }
  0x40   :  { %1482 = vmatpush3.msra.mxu0 %v1951_v54 }
  0x41   :  { %1483 = vmatprep.subr.mxu0 %v1680_v3 }
  0x42   :  { %1484 = vmatpush3.msra.mxu0 %v1960_v55 }
  0x43   :  { %1485 = vmatprep.subr.mxu0 %v1680_v3 }
  0x44   :  { %1486 = vmatpush3.msra.mxu0 %v1969_v56 }
  0xd3   :  { %v1372_v57 = vpop.f32.mrf.mxu0 }
  0xd4   :  { %v1394_v58 = vpop.f32.mrf.mxu1 }
  0xd5   :  { %v139_v59 = vpop.f32.mrf.mxu0  ;;  %v242_v5 = vadd.f32 %v1394_v58, %v1372_v57 }
  0xd6   :  { %v236_v61 = vpop.f32.mrf.mxu1 }
  0xd7   :  { %v237_v1 = vadd.f32 %v236_v61, %v139_v59 }
  0xd8   :  { %v1397_v62 = vpop.f32.mrf.mxu1 }
  0xd9   :  { %v1375_v60 = vpop.f32.mrf.mxu0 }
  0xda   :  { %v246_v2 = vpop.f32.mrf.mxu1  ;;  %v252_v11 = vadd.f32 %v1397_v62, %v1375_v60  ;;  %v1172_v62 = vld [vmem:[%s2243_s2 + $0xf8] sm:$0xff] }
  0xdb   :  { %v149_v63 = vpop.f32.mrf.mxu0  ;;  %1490 = vmatprep.subr.mxu1 %v1172_v62 }
  0xdc   :  { %v247_v8 = vadd.f32 %v246_v2, %v149_v63  ;;  %v1171_v63 = vld [vmem:[%s2243_s2 + $0xf0] sm:$0xff]  ;;  %v1168_v2 = vld [vmem:[%s2243_s2 + $0xd8] sm:$0xff] }
  0xe5   :  { %v1416_v0 = vpop.f32.mrf.mxu0 }
  0xe6   :  { %v366_v9 = vadd.f32 %v1416_v0, %v242_v5  ;;  %v1170_v0 = vld [vmem:[%s2243_s2 + $0xe8] sm:$0xff]  ;;  %v1167_v5 = vld [vmem:[%s2243_s2 + $0xd0] sm:$0xff] }
  0xe7   :  { %v346_v4 = vpop.f32.mrf.mxu0 }
  0xe8   :  { %v365_v6 = vadd.f32 %v346_v4, %v237_v1  ;;  %v1169_v1 = vld [vmem:[%s2243_s2 + $0xe0] sm:$0xff]  ;;  %v608_v4 = vld [vmem:[%s2243_s2 + $0x78] sm:$0xff] }
  0xe9   :  { %v1419_v7 = vpop.f32.mrf.mxu0  ;;  %1528 = vmatprep.subr.mxu0 %v608_v4 }
  0xea   :  { %v387_v12 = vadd.f32 %v366_v9, %v365_v6  ;;  %v368_v14 = vadd.f32 %v1419_v7, %v252_v11  ;;  %v1166_v7 = vld [vmem:[%s2243_s2 + $0xc8] sm:$0xff]  ;;  %v1164_v11 = vld [vmem:[%s2243_s2 + $0xb8] sm:$0xff] }
  0xeb   :  { %v356_v10 = vpop.f32.mrf.mxu0 }
  0xec   :  { %v367_v13 = vadd.f32 %v356_v10, %v247_v8  ;;  %v606_v8 = vld [vmem:[%s2243_s2 + $0x68] sm:$0xff]  ;;  %v605_v10 = vld [vmem:[%s2243_s2 + $0x60] sm:$0xff] }
  0xee   :  { %v388_v15 = vadd.f32 %v387_v12, %v367_v13  ;;  %v604_v12 = vld [vmem:[%s2243_s2 + $0x58] sm:$0xff] }
  0xf0   :  { %v389_v16 = vadd.f32 %v388_v15, %v368_v14  ;;  %v1162_v15 = vld [vmem:[%s2243_s2 + $0xa8] sm:$0xff] }
  0xf2   :  { %v390_v17 = vrot.slane %v389_v16, 4 }
  0xf4   :  { %v391_v18 = vadd.f32 %v390_v17, %v389_v16  ;;  %v602_v16 = vld [vmem:[%s2243_s2 + $0x48] sm:$0xff]  ;;  %v1161_v17 = vld [vmem:[%s2243_s2 + $0xa0] sm:$0xff] }
  0xf6   :  { %v392_v19 = vrot.slane %v391_v18, 2 }
  0xf8   :  { %v393_v20 = vadd.f32 %v392_v19, %v391_v18  ;;  %v601_v18 = vld [vmem:[%s2243_s2 + $0x40] sm:$0xff]  ;;  %v1160_v19 = vld [vmem:[%s2243_s2 + $0x98] sm:$0xff] }
  0xfa   :  { %v394_v21 = vrot.slane %v393_v20, 1 }
  0xfc   :  { %v395_v22 = vadd.f32 %v394_v21, %v393_v20  ;;  %v600_v20 = vld [vmem:[%s2243_s2 + $0x38] sm:$0xff]  ;;  %v1159_v21 = vld [vmem:[%s2243_s2 + $0x90] sm:$0xff] }
  0xfe   :  { %1453 = vmatmul.mubr.f32.vlgmr.msra.gmra.mxu1 %v395_v22  ;;  %v599_v22 = vld [vmem:[%s2243_s2 + $0x30] sm:$0xff] }
  0xff   :  { %1491 = vmatpush3.msra.mxu1 %v1172_v62 }
 0x100   :  { %1492 = vmatprep.subr.mxu1 %v1171_v63 }
 0x101   :  { %1493 = vmatpush3.msra.mxu1 %v1171_v63 }
 0x102   :  { %1494 = vmatprep.subr.mxu1 %v1170_v0 }
 0x103   :  { %1495 = vmatpush3.msra.mxu1 %v1170_v0 }
 0x104   :  { %1496 = vmatprep.subr.mxu1 %v1169_v1 }
 0x105   :  { %1497 = vmatpush3.msra.mxu1 %v1169_v1 }
 0x106   :  { %1498 = vmatprep.subr.mxu1 %v1168_v2 }
 0x107   :  { %1499 = vmatpush3.msra.mxu1 %v1168_v2 }
 0x108   :  { %1500 = vmatprep.subr.mxu1 %v1167_v5 }
 0x109   :  { %1501 = vmatpush3.msra.mxu1 %v1167_v5 }
 0x10a   :  { %1502 = vmatprep.subr.mxu1 %v1166_v7 }
 0x10b   :  { %1503 = vmatpush3.msra.mxu1 %v1166_v7 }
 0x1be   :  { %v462_v26 = vpop.f32.mrf.mxu1 }
 0x1bf   :  { %v469_v27 = vrot.slane %v462_v26, %v1978_v25  ;;  %v1157_v26 = vld [vmem:[%s2243_s2 + $0x80] sm:$0xff] }
 0x1c0   :  { %v1454_v28 = vpop.f32.mrf.mxu1 }
 0x1c1   :  { %v1981_v29 = vsub.f32 %v365_v6, %v469_v27  ;;  %v1983_v30 = vsub.f32 %v366_v9, %v469_v27  ;;  %v1985_v31 = vsub.f32 %v367_v13, %v469_v27  ;;  %v1987_v32 = vsub.f32 %v368_v14, %v469_v27  ;;  %v607_v6 = vld [vmem:[%s2243_s2 + $0x70] sm:$0xff]  ;;  %v1165_v9 = vld [vmem:[%s2243_s2 + $0xc0] sm:$0xff]  ;;  %v1188_v28 = vld [vmem:[%s2243_s2 + $0x178] sm:$0xff] }
 0x1c2   :  { %1504 = vmatprep.subr.mxu1 %v1165_v9  ;;  %v1163_v13 = vld [vmem:[%s2243_s2 + $0xb0] sm:$0xff]  ;;  %v597_v27 = vld [vmem:[%s2243_s2 + $0x20] sm:$0xff] }
 0x1c3   :  { %v474_v33 = vmul.f32 %v1981_v29, %v1981_v29  ;;  %v475_v34 = vmul.f32 %v1983_v30, %v1983_v30  ;;  %v476_v35 = vmul.f32 %v1985_v31, %v1985_v31  ;;  %v477_v37 = vmul.f32 %v1987_v32, %v1987_v32  ;;  %1505 = vmatpush3.msra.mxu1 %v1165_v9  ;;  %v603_v14 = vld [vmem:[%s2243_s2 + $0x50] sm:$0xff] }
 0x1c4   :  { %1506 = vmatprep.subr.mxu1 %v1164_v11 }
 0x1c5   :  { %v478_v36 = vadd.f32 %v475_v34, %v474_v33  ;;  %1507 = vmatpush3.msra.mxu1 %v1164_v11  ;;  %v596_v33 = vld [vmem:[%s2243_s2 + $0x18] sm:$0xff]  ;;  %v595_v34 = vld [vmem:[%s2243_s2 + $0x10] sm:$0xff] }
 0x1c6   :  { %1508 = vmatprep.subr.mxu1 %v1163_v13  ;;  %v1184_v11 = vld [vmem:[%s2243_s2 + $0x158] sm:$0xff] }
 0x1c7   :  { %v479_v38 = vadd.f32 %v478_v36, %v476_v35  ;;  %1509 = vmatpush3.msra.mxu1 %v1163_v13  ;;  %v594_v35 = vld [vmem:[%s2243_s2 + $0x8] sm:$0xff]  ;;  %v593_v36 = vld [vmem:[%s2243_s2] sm:$0xff] }
 0x1c8   :  { %1510 = vmatprep.subr.mxu1 %v1162_v15 }
 0x1c9   :  { %v480_v39 = vadd.f32 %v479_v38, %v477_v37  ;;  %1511 = vmatpush3.msra.mxu1 %v1162_v15  ;;  %v1182_v15 = vld [vmem:[%s2243_s2 + $0x148] sm:$0xff] }
 0x1ca   :  { %1512 = vmatprep.subr.mxu1 %v1161_v17 }
 0x1cb   :  { %v481_v40 = vrot.slane %v480_v39, 4  ;;  %1513 = vmatpush3.msra.mxu1 %v1161_v17  ;;  %v1181_v17 = vld [vmem:[%s2243_s2 + $0x140] sm:$0xff] }
 0x1cc   :  { %1514 = vmatprep.subr.mxu1 %v1160_v19 }
 0x1cd   :  { %v482_v57 = vadd.f32 %v481_v40, %v480_v39  ;;  %1515 = vmatpush3.msra.mxu1 %v1160_v19  ;;  %v385_v40 = vld [vmem:[%s2244_s3] sm:$0x1]  ;;  %v1179_v19 = vld [vmem:[%s2243_s2 + $0x130] sm:$0xff] }
 0x1ce   :  { %1516 = vmatprep.subr.mxu1 %v1159_v21 }
 0x1cf   :  { %v483_v58 = vrot.slane %v482_v57, 2  ;;  %1517 = vmatpush3.msra.mxu1 %v1159_v21  ;;  %v1177_v21 = vld [vmem:[%s2243_s2 + $0x120] sm:$0xff] }
 0x1d0   :  { %1518 = vmatprep.subr.mxu1 %v1158_v23 }
 0x1d1   :  { %v484_v59 = vadd.f32 %v483_v58, %v482_v57  ;;  %1519 = vmatpush3.msra.mxu1 %v1158_v23  ;;  %v1175_v23 = vld [vmem:[%s2243_s2 + $0x110] sm:$0xff] }
 0x1d2   :  { %1520 = vmatprep.subr.mxu1 %v1157_v26 }
 0x1d3   :  { %v485_v60 = vrot.slane %v484_v59, 1  ;;  %1521 = vmatpush3.msra.mxu1 %v1157_v26  ;;  %v1173_v26 = vld [vmem:[%s2243_s2 + $0x100] sm:$0xff] }
 0x1d4   :  { %1566 = vmatprep.subr.mxu1 %v1188_v28 }
 0x1d5   :  { %v486_v61 = vadd.f32 %v485_v60, %v484_v59  ;;  %v1156_v60 = vld [vmem:[%s2244_s3 + $0x1] ss:$0 sm:$0xff] }
 0x1d7   :  { %1488 = vmatmul.mubr.f32.vlgmr.msra.gmra.mxu0 %v486_v61 }
 0x1d8   :  { %1529 = vmatpush3.msra.mxu0 %v608_v4 }
 0x1d9   :  { %1530 = vmatprep.subr.mxu0 %v607_v6 }
 0x1da   :  { %1531 = vmatpush3.msra.mxu0 %v607_v6 }
 0x1db   :  { %1532 = vmatprep.subr.mxu0 %v606_v8 }
 0x1dc   :  { %1533 = vmatpush3.msra.mxu0 %v606_v8 }
 0x1dd   :  { %1534 = vmatprep.subr.mxu0 %v605_v10 }
 0x1de   :  { %1535 = vmatpush3.msra.mxu0 %v605_v10 }
 0x1df   :  { %1536 = vmatprep.subr.mxu0 %v604_v12 }
 0x1e0   :  { %1537 = vmatpush3.msra.mxu0 %v604_v12 }
 0x1e1   :  { %1538 = vmatprep.subr.mxu0 %v603_v14 }
 0x1e2   :  { %1539 = vmatpush3.msra.mxu0 %v603_v14  ;;  %v1183_v14 = vld [vmem:[%s2243_s2 + $0x150] sm:$0xff] }
 0x1e3   :  { %1540 = vmatprep.subr.mxu0 %v602_v16 }
 0x1e4   :  { %1541 = vmatpush3.msra.mxu0 %v602_v16 }
 0x1e5   :  { %1542 = vmatprep.subr.mxu0 %v601_v18 }
 0x1e6   :  { %1543 = vmatpush3.msra.mxu0 %v601_v18  ;;  %v1180_v18 = vld [vmem:[%s2243_s2 + $0x138] sm:$0xff] }
 0x1e7   :  { %1544 = vmatprep.subr.mxu0 %v600_v20 }
 0x1e8   :  { %1545 = vmatpush3.msra.mxu0 %v600_v20  ;;  %v1178_v20 = vld [vmem:[%s2243_s2 + $0x128] sm:$0xff] }
 0x1e9   :  { %1546 = vmatprep.subr.mxu0 %v599_v22 }
 0x1ea   :  { %1547 = vmatpush3.msra.mxu0 %v599_v22  ;;  %v1176_v22 = vld [vmem:[%s2243_s2 + $0x118] sm:$0xff] }
 0x1eb   :  { %1548 = vmatprep.subr.mxu0 %v598_v24 }
 0x1ec   :  { %1549 = vmatpush3.msra.mxu0 %v598_v24  ;;  %v1174_v24 = vld [vmem:[%s2243_s2 + $0x108] sm:$0xff] }
 0x1ed   :  { %1550 = vmatprep.subr.mxu0 %v597_v27 }
 0x1ee   :  { %1551 = vmatpush3.msra.mxu0 %v597_v27 }
 0x1ef   :  { %1552 = vmatprep.subr.mxu0 %v596_v33 }
 0x1f0   :  { %1553 = vmatpush3.msra.mxu0 %v596_v33 }
 0x1f1   :  { %1554 = vmatprep.subr.mxu0 %v595_v34 }
 0x1f2   :  { %1555 = vmatpush3.msra.mxu0 %v595_v34 }
 0x1f3   :  { %1556 = vmatprep.subr.mxu0 %v594_v35 }
 0x1f4   :  { %1557 = vmatpush3.msra.mxu0 %v594_v35 }
 0x1f5   :  { %1558 = vmatprep.subr.mxu0 %v593_v36 }
 0x1f6   :  { %1559 = vmatpush3.msra.mxu0 %v593_v36 }
 0x1f7   :  { %1604 = vmatprep.subr.mxu0 %v1680_v3 }
 0x297   :  { %v553_v37 = vpop.f32.mrf.mxu0 }
 0x298   :  { %v554_v38 = vadd.f32 1e-05, %v553_v37 }
 0x299   :  { %v1489_v39 = vpop.f32.mrf.mxu0 }
 0x29a   :  { %1676 = vrsqrt.f32 %v554_v38 }
 0x2a7   :  { %v1677_v57 = vpop.eup %1676 }
 0x2a8   :  { %v558_v58 = vmul.f32 %v1677_v57, %v385_v40 }
 0x2aa   :  { %v562_v59 = vrot.slane %v558_v58, %v1978_v25 }
 0x2ac   :  { %v563_v61 = vmul.f32 %v562_v59, %v1981_v29  ;;  %v564_v62 = vmul.f32 %v562_v59, %v1983_v30  ;;  %v565_v63 = vmul.f32 %v562_v59, %v1985_v31  ;;  %v566_v0 = vmul.f32 %v562_v59, %v1987_v32  ;;  %v1187_v29 = vld [vmem:[%s2243_s2 + $0x170] sm:$0xff]  ;;  %v1186_v30 = vld [vmem:[%s2243_s2 + $0x168] sm:$0xff]  ;;  %v1185_v31 = vld [vmem:[%s2243_s2 + $0x160] sm:$0xff] }
 0x2ae   :  { %v571_v1 = vadd.f32 %v1156_v60, %v563_v61  ;;  %v572_v2 = vadd.f32 %v1156_v60, %v564_v62  ;;  %v573_v4 = vadd.f32 %v1156_v60, %v565_v63  ;;  %v574_v5 = vadd.f32 %v1156_v60, %v566_v0 }
 0x2b0   :  { %v575_v6 = vmax.f32 %v571_v1, 0.0  ;;  %v576_v7 = vmax.f32 %v572_v2, 0.0  ;;  %v577_v8 = vmax.f32 %v573_v4, 0.0  ;;  %v578_v9 = vmax.f32 %v574_v5, 0.0 }
 0x2b2   :  { %585 = vst [vmem:[#allocation3 + $0x1] sm:$0xff] %v575_v6  ;;  %586 = vst [vmem:[#allocation3 + $0x9] sm:$0xff] %v576_v7  ;;  %1522 = vmatprep.mubr.f32.mxu1 %v575_v6 }
 0x2b3   :  { %587 = vst [vmem:[#allocation3 + $0x19] sm:$0xff] %v577_v8  ;;  %588 = vst [vmem:[#allocation3 + $0x21] sm:$0xff] %v578_v9  ;;  %1523 = vmatmul.mubr.f32.vlgmr.msra.gmra.mxu1 %v576_v7 }
 0x2b4   :  { %1567 = vmatpush3.msra.mxu1 %v1188_v28  ;;  %1525 = vmatprep.mubr.f32.mxu1 %v577_v8 }
 0x2b5   :  { %1568 = vmatprep.subr.mxu1 %v1187_v29 }
 0x2b6   :  { %1569 = vmatpush3.msra.mxu1 %v1187_v29 }
 0x2b7   :  { %1570 = vmatprep.subr.mxu1 %v1186_v30  ;;  %1526 = vmatmul.mubr.f32.gmra.mxu1 %v578_v9 }
 0x2b8   :  { %1571 = vmatpush3.msra.mxu1 %v1186_v30 }
 0x2b9   :  { %v589_v32 = vld [vmem:[#allocation3] sm:$0xff]  ;;  %v590_v10 = vld [vmem:[#allocation3 + $0x8] sm:$0xff]  ;;  %1572 = vmatprep.subr.mxu1 %v1185_v31 }
 0x2ba   :  { %1560 = vmatprep.mubr.f32.mxu0 %v589_v32  ;;  %v800_v12 = vld [vmem:[#allocation3 + $0x2] sm:$0xff]  ;;  %1573 = vmatpush3.msra.mxu1 %v1185_v31  ;;  %v591_v13 = vld [vmem:[#allocation3 + $0x18] sm:$0xff]  ;;  %v801_v27 = vld [vmem:[#allocation3 + $0xa] sm:$0xff] }
 0x2bb   :  { %1561 = vmatmul.mubr.f32.vlgmr.msra.gmra.mxu0 %v590_v10  ;;  %1598 = vmatprep.mubr.f32.mxu1 %v800_v12  ;;  %v592_v16 = vld [vmem:[#allocation3 + $0x20] sm:$0xff] }
 0x2bc   :  { %1563 = vmatprep.mubr.f32.mxu0 %v591_v13  ;;  %1574 = vmatprep.subr.mxu1 %v1184_v11  ;;  %v802_v28 = vld [vmem:[#allocation3 + $0x1a] sm:$0xff]  ;;  %v803_v33 = vld [vmem:[#allocation3 + $0x22] sm:$0xff] }
 0x2bd   :  { %1575 = vmatpush3.msra.mxu1 %v1184_v11  ;;  %1605 = vmatpush3.msra.mxu0 %v1835_v41 }
 0x2be   :  { %1576 = vmatprep.subr.mxu1 %v1183_v14  ;;  %1606 = vmatprep.subr.mxu0 %v1680_v3 }
 0x2bf   :  { %1564 = vmatmul.mubr.f32.gmra.mxu0 %v592_v16  ;;  %1577 = vmatpush3.msra.mxu1 %v1183_v14 }
 0x2c0   :  { %1578 = vmatprep.subr.mxu1 %v1182_v15  ;;  %1607 = vmatpush3.msra.mxu0 %v1841_v42 }
 0x2c1   :  { %1579 = vmatpush3.msra.mxu1 %v1182_v15  ;;  %1608 = vmatprep.subr.mxu0 %v1680_v3 }
 0x2c2   :  { %1580 = vmatprep.subr.mxu1 %v1181_v17  ;;  %1609 = vmatpush3.msra.mxu0 %v1848_v43 }
 0x2c3   :  { %1581 = vmatpush3.msra.mxu1 %v1181_v17  ;;  %1610 = vmatprep.subr.mxu0 %v1680_v3 }
 0x2c4   :  { %1582 = vmatprep.subr.mxu1 %v1180_v18  ;;  %1611 = vmatpush3.msra.mxu0 %v1862_v44 }
 0x2c5   :  { %1583 = vmatpush3.msra.mxu1 %v1180_v18  ;;  %1612 = vmatprep.subr.mxu0 %v1680_v3  ;;  %v926_v18 = vld [vmem:[%s2244_s3 + $0x2] sm:$0x1] }
 0x2c6   :  { %1584 = vmatprep.subr.mxu1 %v1179_v19  ;;  %1613 = vmatpush3.msra.mxu0 %v1870_v45 }
 0x2c7   :  { %1585 = vmatpush3.msra.mxu1 %v1179_v19  ;;  %1614 = vmatprep.subr.mxu0 %v1680_v3 }
 0x2c8   :  { %1586 = vmatprep.subr.mxu1 %v1178_v20  ;;  %1615 = vmatpush3.msra.mxu0 %v1879_v46 }
 0x2c9   :  { %1587 = vmatpush3.msra.mxu1 %v1178_v20  ;;  %1616 = vmatprep.subr.mxu0 %v1680_v3 }
 0x2ca   :  { %1588 = vmatprep.subr.mxu1 %v1177_v21  ;;  %1617 = vmatpush3.msra.mxu0 %v1888_v47 }
 0x2cb   :  { %1589 = vmatpush3.msra.mxu1 %v1177_v21  ;;  %1618 = vmatprep.subr.mxu0 %v1680_v3 }
 0x2cc   :  { %1590 = vmatprep.subr.mxu1 %v1176_v22  ;;  %1619 = vmatpush3.msra.mxu0 %v1897_v48 }
 0x2cd   :  { %1591 = vmatpush3.msra.mxu1 %v1176_v22  ;;  %1620 = vmatprep.subr.mxu0 %v1680_v3  ;;  %v1189_v22 = vld [vmem:[%s2244_s3 + $0x3] ss:$0 sm:$0xff] }
 0x2ce   :  { %1592 = vmatprep.subr.mxu1 %v1175_v23  ;;  %1621 = vmatpush3.msra.mxu0 %v1906_v49 }
 0x2cf   :  { %1593 = vmatpush3.msra.mxu1 %v1175_v23  ;;  %1622 = vmatprep.subr.mxu0 %v1680_v3 }
 0x2d0   :  { %1594 = vmatprep.subr.mxu1 %v1174_v24  ;;  %1623 = vmatpush3.msra.mxu0 %v1915_v50 }
 0x2d1   :  { %1595 = vmatpush3.msra.mxu1 %v1174_v24  ;;  %1624 = vmatprep.subr.mxu0 %v1680_v3 }
 0x2d2   :  { %1596 = vmatprep.subr.mxu1 %v1173_v26  ;;  %1625 = vmatpush3.msra.mxu0 %v1924_v51 }
 0x2d3   :  { %1597 = vmatpush3.msra.mxu1 %v1173_v26  ;;  %1626 = vmatprep.subr.mxu0 %v1680_v3 }
 0x2d4   :  { %1599 = vmatmul.mubr.f32.vlgmr.msra.gmra.mxu1 %v801_v27  ;;  %1627 = vmatpush3.msra.mxu0 %v1933_v52 }
 0x2d5   :  { %1601 = vmatprep.mubr.f32.mxu1 %v802_v28  ;;  %1628 = vmatprep.subr.mxu0 %v1680_v3 }
 0x2d6   :  { %1629 = vmatpush3.msra.mxu0 %v1942_v53  ;;  %1636 = vmatprep.mubr.msk.f32.mxu0 %vm1681_vm2, %v1680_v3 }
 0x2d7   :  { %1630 = vmatprep.subr.mxu0 %v1680_v3  ;;  %1639 = vmatprep.subr.mxu1 %v1680_v3 }
 0x2d8   :  { %1602 = vmatmul.mubr.f32.gmra.mxu1 %v803_v33  ;;  %1631 = vmatpush3.msra.mxu0 %v1951_v54 }
 0x2d9   :  { %1632 = vmatprep.subr.mxu0 %v1680_v3  ;;  %1640 = vmatpush3.msra.mxu1 %v1835_v41 }
 0x2da   :  { %1633 = vmatpush3.msra.mxu0 %v1960_v55  ;;  %1641 = vmatprep.subr.mxu1 %v1680_v3 }
 0x2db   :  { %1634 = vmatprep.subr.mxu0 %v1680_v3  ;;  %1642 = vmatpush3.msra.mxu1 %v1841_v42 }
 0x2dc   :  { %1635 = vmatpush3.msra.mxu0 %v1969_v56  ;;  %1643 = vmatprep.subr.mxu1 %v1680_v3 }
 0x2dd   :  { %1644 = vmatpush3.msra.mxu1 %v1848_v43  ;;  %1671 = vmatprep.mubr.msk.f32.mxu1 %vm1681_vm2, %v1680_v3 }
 0x2de   :  { %1645 = vmatprep.subr.mxu1 %v1680_v3 }
 0x2df   :  { %1646 = vmatpush3.msra.mxu1 %v1862_v44 }
 0x2e0   :  { %1647 = vmatprep.subr.mxu1 %v1680_v3 }
 0x2e1   :  { %1648 = vmatpush3.msra.mxu1 %v1870_v45 }
 0x2e2   :  { %1649 = vmatprep.subr.mxu1 %v1680_v3 }
 0x2e3   :  { %1650 = vmatpush3.msra.mxu1 %v1879_v46 }
 0x2e4   :  { %1651 = vmatprep.subr.mxu1 %v1680_v3 }
 0x2e5   :  { %1652 = vmatpush3.msra.mxu1 %v1888_v47 }
 0x2e6   :  { %1653 = vmatprep.subr.mxu1 %v1680_v3 }
 0x2e7   :  { %1654 = vmatpush3.msra.mxu1 %v1897_v48 }
 0x2e8   :  { %1655 = vmatprep.subr.mxu1 %v1680_v3 }
 0x2e9   :  { %1656 = vmatpush3.msra.mxu1 %v1906_v49 }
 0x2ea   :  { %1657 = vmatprep.subr.mxu1 %v1680_v3 }
 0x2eb   :  { %1658 = vmatpush3.msra.mxu1 %v1915_v50 }
 0x2ec   :  { %1659 = vmatprep.subr.mxu1 %v1680_v3 }
 0x2ed   :  { %1660 = vmatpush3.msra.mxu1 %v1924_v51 }
 0x2ee   :  { %1661 = vmatprep.subr.mxu1 %v1680_v3 }
 0x2ef   :  { %1662 = vmatpush3.msra.mxu1 %v1933_v52 }
 0x2f0   :  { %1663 = vmatprep.subr.mxu1 %v1680_v3 }
 0x2f1   :  { %1664 = vmatpush3.msra.mxu1 %v1942_v53 }
 0x2f2   :  { %1665 = vmatprep.subr.mxu1 %v1680_v3 }
 0x2f3   :  { %1666 = vmatpush3.msra.mxu1 %v1951_v54 }
 0x2f4   :  { %1667 = vmatprep.subr.mxu1 %v1680_v3 }
 0x2f5   :  { %1668 = vmatpush3.msra.mxu1 %v1960_v55 }
 0x2f6   :  { %1669 = vmatprep.subr.mxu1 %v1680_v3 }
 0x2f7   :  { %1670 = vmatpush3.msra.mxu1 %v1969_v56 }
 0x373   :  { %v1524_v41 = vpop.f32.mrf.mxu1 }
 0x375   :  { %v696_v43 = vpop.f32.mrf.mxu1 }
 0x377   :  { %v1527_v45 = vpop.f32.mrf.mxu1 }
 0x379   :  { %v706_v47 = vpop.f32.mrf.mxu1 }
 0x37b   :  { %v1562_v42 = vpop.f32.mrf.mxu0 }
 0x37c   :  { %v787_v52 = vadd.f32 %v1562_v42, %v1524_v41 }
 0x37d   :  { %v781_v44 = vpop.f32.mrf.mxu0 }
 0x37e   :  { %v782_v49 = vadd.f32 %v781_v44, %v696_v43 }
 0x37f   :  { %v1565_v46 = vpop.f32.mrf.mxu0 }
 0x380   :  { %v797_v3 = vadd.f32 %v1565_v46, %v1527_v45 }
 0x381   :  { %v791_v50 = vpop.f32.mrf.mxu0 }
 0x382   :  { %v792_v34 = vadd.f32 %v791_v50, %v706_v47 }
 0x394   :  { %v1600_v48 = vpop.f32.mrf.mxu1 }
 0x395   :  { %v907_v55 = vadd.f32 %v1600_v48, %v787_v52 }
 0x396   :  { %v887_v51 = vpop.f32.mrf.mxu1 }
 0x397   :  { %v906_v53 = vadd.f32 %v887_v51, %v782_v49 }
 0x398   :  { %v1603_v54 = vpop.f32.mrf.mxu1 }
 0x399   :  { %v928_v36 = vadd.f32 %v907_v55, %v906_v53  ;;  %v909_v37 = vadd.f32 %v1603_v54, %v797_v3 }
 0x39a   :  { %v897_v35 = vpop.f32.mrf.mxu1 }
 0x39b   :  { %v908_v56 = vadd.f32 %v897_v35, %v792_v34 }
 0x39d   :  { %v929_v38 = vadd.f32 %v928_v36, %v908_v56 }
 0x39f   :  { %v930_v39 = vadd.f32 %v929_v38, %v909_v37 }
 0x3a1   :  { %v931_v40 = vrot.slane %v930_v39, 4 }
 0x3a3   :  { %v932_v57 = vadd.f32 %v931_v40, %v930_v39 }
 0x3a5   :  { %v933_v58 = vrot.slane %v932_v57, 2 }
 0x3a7   :  { %v934_v59 = vadd.f32 %v933_v58, %v932_v57 }
 0x3a9   :  { %v935_v60 = vrot.slane %v934_v59, 1 }
 0x3ab   :  { %v936_v61 = vadd.f32 %v935_v60, %v934_v59 }
 0x3ad   :  { %1637 = vmatmul.mubr.f32.vlgmr.msra.gmra.mxu0 %v936_v61 }
 0x46d   :  { %v1003_v62 = vpop.f32.mrf.mxu0 }
 0x46e   :  { %v1010_v63 = vrot.slane %v1003_v62, %v1978_v25 }
 0x46f   :  { %v1638_v0 = vpop.f32.mrf.mxu0 }
 0x470   :  { %v1011_v1 = vsub.f32 %v906_v53, %v1010_v63  ;;  %v1012_v2 = vsub.f32 %v907_v55, %v1010_v63  ;;  %v1013_v4 = vsub.f32 %v908_v56, %v1010_v63  ;;  %v1014_v5 = vsub.f32 %v909_v37, %v1010_v63 }
 0x472   :  { %v1015_v6 = vmul.f32 %v1011_v1, %v1011_v1  ;;  %v1016_v7 = vmul.f32 %v1012_v2, %v1012_v2  ;;  %v1017_v8 = vmul.f32 %v1013_v4, %v1013_v4  ;;  %v1018_v29 = vmul.f32 %v1014_v5, %v1014_v5 }
 0x474   :  { %v1019_v9 = vadd.f32 %v1016_v7, %v1015_v6 }
 0x476   :  { %v1020_v30 = vadd.f32 %v1019_v9, %v1017_v8 }
 0x478   :  { %v1021_v31 = vadd.f32 %v1020_v30, %v1018_v29 }
 0x47a   :  { %v1022_v32 = vrot.slane %v1021_v31, 4 }
 0x47c   :  { %v1023_v10 = vadd.f32 %v1022_v32, %v1021_v31 }
 0x47e   :  { %v1024_v11 = vrot.slane %v1023_v10, 2 }
 0x480   :  { %v1025_v12 = vadd.f32 %v1024_v11, %v1023_v10 }
 0x482   :  { %v1026_v13 = vrot.slane %v1025_v12, 1 }
 0x484   :  { %v1027_v14 = vadd.f32 %v1026_v13, %v1025_v12 }
 0x486   :  { %1672 = vmatmul.mubr.f32.vlgmr.msra.gmra.mxu1 %v1027_v14 }
 0x546   :  { %v1094_v15 = vpop.f32.mrf.mxu1 }
 0x547   :  { %v1095_v16 = vadd.f32 1e-05, %v1094_v15 }
 0x548   :  { %v1673_v17 = vpop.f32.mrf.mxu1 }
 0x549   :  { %1678 = vrsqrt.f32 %v1095_v16 }
 0x556   :  { %v1679_v19 = vpop.eup %1678 }
 0x557   :  { %v1099_v20 = vmul.f32 %v1679_v19, %v926_v18 }
 0x559   :  { %v1103_v21 = vrot.slane %v1099_v20, %v1978_v25 }
 0x55b   :  { %v1104_v23 = vmul.f32 %v1103_v21, %v1011_v1  ;;  %v1105_v24 = vmul.f32 %v1103_v21, %v1012_v2  ;;  %v1106_v26 = vmul.f32 %v1103_v21, %v1013_v4  ;;  %v1107_v27 = vmul.f32 %v1103_v21, %v1014_v5 }
 0x55d   :  { %v1112_v28 = vadd.f32 %v1189_v22, %v1104_v23  ;;  %v1113_v33 = vadd.f32 %v1189_v22, %v1105_v24  ;;  %v1114_v41 = vadd.f32 %v1189_v22, %v1106_v26  ;;  %v1115_v42 = vadd.f32 %v1189_v22, %v1107_v27 }
 0x55f   :  { %v1116_v43 = vmax.f32 %v1112_v28, 0.0  ;;  %v1117_v44 = vmax.f32 %v1113_v33, 0.0  ;;  %v1118_v45 = vmax.f32 %v1114_v41, 0.0  ;;  %v1119_v46 = vmax.f32 %v1115_v42, 0.0 }
 0x561   :  { %1120 = vst [vmem:[%s2245_s5] sm:$0xff] %v1116_v43  ;;  %1121 = vst [vmem:[%s2245_s5 + $0x8] sm:$0xff] %v1117_v44 }
 0x562   :  { %1122 = vst [vmem:[%s2245_s5 + $0x10] sm:$0xff] %v1118_v45  ;;  %1123 = vst [vmem:[%s2245_s5 + $0x18] sm:$0xff] %v1119_v46 }

</bundles_post_ra>
